<compile_context>
chip_gen: v6e
topology: v6e:2x2x1
jax: 0.10.0
libtpu: 0.0.40
codegen_flags: <defaults>
</compile_context>

<pallas_src>
from functools import partial

import numpy as np
import jax
import jax.numpy as jnp
from jax import lax
from jax.experimental import pallas as pl
from jax.experimental.pallas import tpu as pltpu

# bf16 MXU inputs (cast once in wrappers/params, never per-tile on resident weights);
# accumulation stays f32 via preferred_element_type.  The torch module runs the attention in f32;
# validate end-to-end tolerance if bit-faithfulness is required.
MXU_DTYPE = jnp.bfloat16


# ----------------------------------------------------------------------------
# helpers
# ----------------------------------------------------------------------------

def _round_up(x, m):
    return (x + m - 1) // m * m


def _pad_rows(x2d, multiple):
    n = x2d.shape[0]
    pn = _round_up(n, multiple)
    if pn == n:
        return x2d
    return jnp.pad(x2d, ((0, pn - n), (0, 0)))


def _vmem_capacity_bytes():
    try:
        info = pltpu.get_tpu_info()
        cap = getattr(info, "vmem_capacity_bytes", None)
        if cap:
            return int(cap)
    except Exception:
        pass
    return 128 << 20  # v5e / v6e default


def _compiler_params(n_grid_axes, vmem_bytes):
    # Headroom: request at most ~3/4 of physical VMEM (~48 MiB on 64 MiB v7x, ~96 MiB on
    # 128 MiB v5e/v6e) instead of the whole part; never request less than 16 MiB.
    ceiling = (_vmem_capacity_bytes() * 3) // 4
    req = max(16 << 20, int(vmem_bytes) * 2)
    return pltpu.CompilerParams(
        dimension_semantics=("parallel",) * n_grid_axes,
        vmem_limit_bytes=int(min(ceiling, req)))


# ----------------------------------------------------------------------------
# Pallas kernels
# ----------------------------------------------------------------------------

def linear_kernel(x_ref, w_ref, b_ref, o_ref):
    # x: (Nt, Cin) bf16, w: (Cin, Cout) bf16, b: (1, Cout) f32
    acc = jnp.dot(x_ref[...], w_ref[...], preferred_element_type=jnp.float32)
    o_ref[...] = (acc + b_ref[...]).astype(o_ref.dtype)


def ln_fused_proj_kernel(x_ref, lnw_ref, lnb_ref, w_ref, b_ref, o_ref, *, eps):
    # LayerNorm (f32) fused into the concatenated offsets/attention-weights projection (bf16 MXU).
    x = x_ref[...]                                   # (rt, C) f32
    mu = jnp.mean(x, axis=-1, keepdims=True)
    xc = x - mu
    var = jnp.mean(xc * xc, axis=-1, keepdims=True)
    xn = xc * lax.rsqrt(var + eps) * lnw_ref[...] + lnb_ref[...]
    acc = jnp.dot(xn.astype(w_ref.dtype), w_ref[...], preferred_element_type=jnp.float32)
    o_ref[...] = (acc + b_ref[...]).astype(o_ref.dtype)


def msda_fused_kernel(proj_ref, ref_ref, ids_ref, q_ref, val_ref, wo_ref, bo_ref,
                      g_ref, o_ref, samp_scr, *, spatial_shapes, num_heads,
                      num_points, group):
    """Deformable sampling + output_proj + gamma residual for one (batch, Lq-tile).

    proj_ref : (Lq_t, num_heads*group) f32, per-head groups [off_x(LP)|off_y(LP)|logits(LP)|pad]
               each starting at a 128-lane boundary.
    ref_ref  : (Lq_t, 2L) f32 per-level reference points (x, y) in [0, 1].
    ids_ref  : (2, Lv) f32 flattened pixel indices per value row: row 0 = x (col), row 1 = y (row).
    q_ref    : (Lq_t, C) f32 original query tile (residual input).
    val_ref  : (Lv, C) bf16 projected value for this batch (levels concatenated row-major).
    wo/bo/g  : output_proj weight (C,C) bf16, bias (1,C) f32, gamma (1,C) f32.
    o_ref    : (Lq_t, C) f32 lane-dense output tile.
    samp_scr : (Lq_t, C) f32 VMEM scratch for the assembled sampled tile.
    """
    L = len(spatial_shapes)
    P = num_points
    LP = L * P
    Lq_t, C = o_ref.shape
    hd = C // num_heads

    proj = proj_ref[...]              # (Lq_t, num_heads*group) f32
    refp = ref_ref[...]               # (Lq_t, 2L) f32

    # Per-head softmax over levels*points (logits live at lane-aligned offsets).
    attn = []
    for h in range(num_heads):
        lg = proj[:, h * group + 2 * LP: h * group + 3 * LP]            # (Lq_t, LP)
        m = jnp.max(lg, axis=-1, keepdims=True)
        e = jnp.exp(lg - m)
        attn.append(e * pl.reciprocal(jnp.sum(e, axis=-1, keepdims=True), approx=True))

    head_acc = [None] * num_heads
    start = 0
    for lvl, (Hl, Wl) in enumerate(spatial_shapes):
        HW = Hl * Wl
        # Per-level constants, hoisted out of the head/point loops (shared by all heads).
        col_ids = ids_ref[0:1, start:start + HW]      # (1, HW) x index of each value row
        row_ids = ids_ref[1:2, start:start + HW]      # (1, HW) y index
        v_lvl = val_ref[start:start + HW, :]          # (HW, C) bf16, sliced once per level
        refx = refp[:, 2 * lvl:2 * lvl + 1] * Wl - 0.5
        refy = refp[:, 2 * lvl + 1:2 * lvl + 2] * Hl - 0.5

        for h in range(num_heads):
            base = h * group + lvl * P
            # (ref + off/size)*size - 0.5  ==  ref*size + off - 0.5  (align_corners=False)
            ux = refx + proj[:, base:base + P]                         # (Lq_t, P)
            uy = refy + proj[:, LP + base:LP + base + P]
            a_l = attn[h][:, lvl * P:(lvl + 1) * P]                    # (Lq_t, P)

            # Separable bilinear "hat" weights; out-of-grid samples contribute 0 automatically
            # (== grid_sample zeros padding).  No corner loops, no clip/valid/compare chains.
            parts = []
            for p_i in range(P):
                wx = jnp.maximum(1.0 - jnp.abs(ux[:, p_i:p_i + 1] - col_ids), 0.0)  # (Lq_t, HW)
                wy = jnp.maximum(1.0 - jnp.abs(uy[:, p_i:p_i + 1] - row_ids), 0.0)
                parts.append(a_l[:, p_i:p_i + 1] * (wx * wy))
            # Pairwise add tree -> one (Lq_t, HW) weight matrix per (level, head); no RMW chain.
            while len(parts) > 1:
                nxt = [parts[i] + parts[i + 1] for i in range(0, len(parts) - 1, 2)]
                if len(parts) & 1:
                    nxt.append(parts[-1])
                parts = nxt
            wagg = parts[0]

            contrib = jnp.dot(wagg.astype(val_ref.dtype), v_lvl[:, h * hd:(h + 1) * hd],
                              preferred_element_type=jnp.float32)       # (Lq_t, hd)
            head_acc[h] = contrib if head_acc[h] is None else head_acc[h] + contrib
        start += HW

    # Assemble the sampled tile without a lane concatenate: per-head writes into VMEM scratch.
    for h in range(num_heads):
        samp_scr[:, h * hd:(h + 1) * hd] = head_acc[h]

    # Fused output_proj + gamma residual:  o = q + gamma * (sampled @ Wo + bo)
    attn_out = jnp.dot(samp_scr[...].astype(wo_ref.dtype), wo_ref[...],
                       preferred_element_type=jnp.float32) + bo_ref[...]
    o_ref[...] = (q_ref[...] + g_ref[...] * attn_out).astype(o_ref.dtype)


# ----------------------------------------------------------------------------
# pallas_call wrappers
# ----------------------------------------------------------------------------

def tiled_linear(x2d, w, b, row_tile=256, out_dtype=MXU_DTYPE):
    n, cin = x2d.shape
    cout = w.shape[1]
    rt = min(row_tile, _round_up(n, 8))
    xp = _pad_rows(x2d, rt)
    npad = xp.shape[0]
    xb = np.dtype(xp.dtype).itemsize
    wb = np.dtype(w.dtype).itemsize
    ob = np.dtype(out_dtype).itemsize
    vmem = 2 * rt * (cin * xb + cout * ob) + 2 * cin * cout * wb + 4 * cout + 4 * rt * cout
    out = pl.pallas_call(
        linear_kernel,
        out_shape=jax.ShapeDtypeStruct((npad, cout), out_dtype),
        grid=(npad // rt,),
        in_specs=[
            pl.BlockSpec((rt, cin), lambda i: (i, 0)),
            pl.BlockSpec((cin, cout), lambda i: (0, 0)),
            pl.BlockSpec((1, cout), lambda i: (0, 0)),
        ],
        out_specs=pl.BlockSpec((rt, cout), lambda i: (i, 0)),
        compiler_params=_compiler_params(1, vmem),
    )(xp, w, b)
    return out[:n]


def ln_fused_projection(x2d, ln_w, ln_b, w, b, row_tile=256, eps=1e-6):
    n, cin = x2d.shape
    cout = w.shape[1]
    rt = min(row_tile, _round_up(n, 8))
    xp = _pad_rows(x2d, rt)
    npad = xp.shape[0]
    wb = np.dtype(w.dtype).itemsize
    vmem = 2 * 4 * rt * (cin + cout) + 2 * cin * cout * wb + 4 * (2 * cin + cout) + 8 * 4 * rt * cin
    out = pl.pallas_call(
        partial(ln_fused_proj_kernel, eps=eps),
        out_shape=jax.ShapeDtypeStruct((npad, cout), jnp.float32),
        grid=(npad // rt,),
        in_specs=[
            pl.BlockSpec((rt, cin), lambda i: (i, 0)),
            pl.BlockSpec((1, cin), lambda i: (0, 0)),
            pl.BlockSpec((1, cin), lambda i: (0, 0)),
            pl.BlockSpec((cin, cout), lambda i: (0, 0)),
            pl.BlockSpec((1, cout), lambda i: (0, 0)),
        ],
        out_specs=pl.BlockSpec((rt, cout), lambda i: (i, 0)),
        compiler_params=_compiler_params(1, vmem),
    )(xp, ln_w, ln_b, w, b)
    return out[:n]


def msda_fused(proj, refs, level_ids, query, value, wo, bo, gamma,
               spatial_shapes, num_heads, num_points, group, q_tile=256):
    # proj: (B, Lq, pout) f32; refs: (B, Lq, 2L) f32; level_ids: (2, Lv) f32;
    # query: (B, Lq, C) f32; value: (B, Lv, C) bf16; wo: (C, C) bf16; bo/gamma: (1, C) f32.
    B, Lq, pout = proj.shape
    _, Lv, C = value.shape
    L = len(spatial_shapes)
    qt = min(q_tile, _round_up(Lq, 8))
    Lqp = _round_up(Lq, qt)
    if Lqp != Lq:
        pad = ((0, 0), (0, Lqp - Lq), (0, 0))
        proj = jnp.pad(proj, pad)
        refs = jnp.pad(refs, pad)
        query = jnp.pad(query, pad)
    max_hw = max(h * w for h, w in spatial_shapes)
    vb = np.dtype(value.dtype).itemsize
    wb = np.dtype(wo.dtype).itemsize
    # double-buffered tiles + resident bf16 value/Wo + ~12 live (qt, max_HW) f32 temporaries
    vmem = (2 * 4 * qt * (pout + 2 * L + 2 * C) + 2 * (Lv * C * vb + C * C * wb)
            + 4 * qt * C + 12 * 4 * qt * max_hw + 4 * 2 * Lv)
    kern = partial(msda_fused_kernel, spatial_shapes=tuple(spatial_shapes),
                   num_heads=num_heads, num_points=num_points, group=group)
    out = pl.pallas_call(
        kern,
        out_shape=jax.ShapeDtypeStruct((B, Lqp, C), jnp.float32),
        grid=(B, Lqp // qt),            # both axes 'parallel' -> shards across v7x's 2 TCs
        in_specs=[
            pl.BlockSpec((None, qt, pout), lambda b, t: (b, t, 0)),
            pl.BlockSpec((None, qt, 2 * L), lambda b, t: (b, t, 0)),
            pl.BlockSpec((2, Lv), lambda b, t: (0, 0)),
            pl.BlockSpec((None, qt, C), lambda b, t: (b, t, 0)),
            pl.BlockSpec((None, Lv, C), lambda b, t: (b, 0, 0)),   # re-fetched only when b changes
            pl.BlockSpec((C, C), lambda b, t: (0, 0)),
            pl.BlockSpec((1, C), lambda b, t: (0, 0)),
            pl.BlockSpec((1, C), lambda b, t: (0, 0)),
        ],
        out_specs=pl.BlockSpec((None, qt, C), lambda b, t: (b, t, 0)),
        scratch_shapes=[pltpu.VMEM((qt, C), jnp.float32)],
        compiler_params=_compiler_params(2, vmem),
    )(proj, refs, level_ids, query, value, wo, bo, gamma)
    return out[:, :Lq]


# ----------------------------------------------------------------------------
# Injector forward
# ----------------------------------------------------------------------------

def injector_forward(params, query, reference_points, feat, spatial_shapes,
                     level_start_index=None, num_heads=4, num_points=4,
                     row_tile=256, q_tile=256):
    # level_start_index is implied by iterating spatial_shapes in order (canonical concat).
    del level_start_index
    B, Lq, C = query.shape
    Lv = feat.shape[1]
    L = len(spatial_shapes)
    p = params
    group = int(p["qproj_group"])
    query = query.astype(jnp.float32)

    # K2: value projection (bf16 activations/weights cast once here, f32 accumulate) -> bf16 value
    value = tiled_linear(feat.reshape(B * Lv, C).astype(MXU_DTYPE),
                         p["value_proj_w"], p["value_proj_b"],
                         row_tile=row_tile, out_dtype=MXU_DTYPE)
    value = value.reshape(B, Lv, C)

    # K1: query_norm + fused [off_x|off_y|logits] projection (per-head 128-lane aligned groups)
    proj = ln_fused_projection(query.reshape(B * Lq, C), p["qn_w"], p["qn_b"],
                               p["qproj_w"], p["qproj_b"], row_tile=row_tile)
    proj = proj.reshape(B, Lq, -1)

    # reference points -> (B, Lq, 2L)   (mmcv 2-coordinate branch; Lr==1 broadcast or Lr==L)
    ref = reference_points.astype(jnp.float32)
    if ref.ndim == 3:
        ref = ref[:, :, None, :]
    assert ref.shape[-1] == 2, "only the 2-coordinate reference_points branch is implemented"
    if ref.shape[2] == 1:
        ref = jnp.broadcast_to(ref, (B, Lq, L, 2))
    refs = ref.reshape(B, Lq, 2 * L)

    # Flattened (x, y) pixel-index tables for every value row, built once (compile-time constants)
    ids = []
    for (Hl, Wl) in spatial_shapes:
        yy, xx = np.meshgrid(np.arange(Hl, dtype=np.float32),
                             np.arange(Wl, dtype=np.float32), indexing="ij")
        ids.append(np.stack([xx.reshape(-1), yy.reshape(-1)], axis=0))
    level_ids = jnp.asarray(np.concatenate(ids, axis=1))      # (2, Lv)

    # K3: deformable sampling fused with output_proj + gamma residual
    out = msda_fused(proj, refs, level_ids, query, value,
                     p["out_proj_w"], p["out_proj_b"], p["gamma"],
                     spatial_shapes, num_heads, num_points, group, q_tile=q_tile)
    return out.astype(query.dtype)


# ----------------------------------------------------------------------------
# Deterministic parameter init (shapes follow the module __init__)
# ----------------------------------------------------------------------------

def init_params(key, C, num_heads, n_levels, num_points, init_values=0.0):
    LP = n_levels * num_points
    group = _round_up(3 * LP, 128)      # per-head column group, padded to a 128-lane boundary
    ks = jax.random.split(key, 6)

    def nrm(k, shape, s):
        return s * jax.random.normal(k, shape, jnp.float32)

    # torch parameterization: sampling_offsets -> (.., heads, levels, points, 2), attn_w -> (..)
    w_off = nrm(ks[0], (C, num_heads, n_levels, num_points, 2), 0.2)
    b_off = nrm(ks[1], (num_heads, n_levels, num_points, 2), 0.5)
    w_att = nrm(ks[2], (C, num_heads, n_levels, num_points), 0.2)
    b_att = nrm(ks[3], (num_heads, n_levels, num_points), 0.2)

    # Fused per-head column layout: [off_x | off_y | logits | pad] per head, each head group
    # 128-lane aligned.  A real torch-weight port permutes the offset/weight columns the same way.
    wb, bb = [], []
    for h in range(num_heads):
        wb.append(jnp.concatenate([
            w_off[:, h, :, :, 0].reshape(C, LP),
            w_off[:, h, :, :, 1].reshape(C, LP),
            w_att[:, h].reshape(C, LP),
            jnp.zeros((C, group - 3 * LP), jnp.float32)], axis=1))
        bb.append(jnp.concatenate([
            b_off[h, :, :, 0].reshape(1, LP),
            b_off[h, :, :, 1].reshape(1, LP),
            b_att[h].reshape(1, LP),
            jnp.zeros((1, group - 3 * LP), jnp.float32)], axis=1))
    qproj_w = jnp.concatenate(wb, axis=1)
    qproj_b = jnp.concatenate(bb, axis=1)

    return {
        "qproj_group": group,
        "qn_w": jnp.ones((1, C), jnp.float32),
        "qn_b": jnp.zeros((1, C), jnp.float32),
        "qproj_w": qproj_w.astype(MXU_DTYPE),            # bf16 once, here (not per-tile in kernel)
        "qproj_b": qproj_b,                               # biases stay f32
        "value_proj_w": nrm(ks[4], (C, C), 0.1).astype(MXU_DTYPE),
        "value_proj_b": jnp.zeros((1, C), jnp.float32),
        "out_proj_w": nrm(ks[5], (C, C), 0.1).astype(MXU_DTYPE),
        "out_proj_b": jnp.zeros((1, C), jnp.float32),
        # module default init_values=0.0; demo uses 0.5 so the attention path contributes
        "gamma": init_values * jnp.ones((1, C), jnp.float32),
    }


# ----------------------------------------------------------------------------
# Example run
# ----------------------------------------------------------------------------

if __name__ == "__main__":
    key = jax.random.PRNGKey(0)

    B = 2
    C = 32                 # dim
    num_heads = 4          # head_dim = 8
    num_points = 4
    H = W = 8              # ViT feature map -> Lq = 64 query tokens
    Lq = H * W

    # 3-level value pyramid as used by the Injector inside ViT-Adapter
    spatial_shapes = ((16, 16), (8, 8), (4, 4))
    level_start_index = (0, 256, 320)
    L = len(spatial_shapes)
    Lv = sum(h * w for h, w in spatial_shapes)      # 336

    ks = jax.random.split(key, 4)
    query = jax.random.normal(ks[0], (B, Lq, C), jnp.float32)
    feat = jax.random.normal(ks[1], (B, Lv, C), jnp.float32)
    reference_points = jax.random.uniform(ks[2], (B, Lq, 1, 2), jnp.float32)

    params = init_params(ks[3], C, num_heads, L, num_points, init_values=0.5)

    # Small tiles only so the tiny demo exercises every grid; use the 256-512 defaults in
    # production (per measured tile-size sweeps).
    out = injector_forward(params, query, reference_points, feat, spatial_shapes,
                           level_start_index, num_heads=num_heads, num_points=num_points,
                           row_tile=64, q_tile=32)
    out = jax.block_until_ready(out)

    assert out.shape == (B, Lq, C)
    assert bool(jnp.all(jnp.isfinite(out)))
    print("KERNEL_OK")
</pallas_src>

<mosaic_0001>
module attributes {stable_mosaic.version = 11 : i64} {
  func.func @linear_kernel(%arg0: i32, %arg1: memref<64x32xbf16, #tpu.memory_space<vmem>>, %arg2: memref<32x32xbf16, #tpu.memory_space<vmem>>, %arg3: memref<1x32xf32, #tpu.memory_space<vmem>>, %arg4: memref<64x32xbf16, #tpu.memory_space<vmem>>) attributes {dimension_semantics = [#tpu.dimension_semantics<parallel>], iteration_bounds = array<i64: 11>, scalar_prefetch = 0 : i64, scratch_operands = 0 : i64, tpu.core_type = #tpu.core_type<tc>, window_params = [{transform_indices = @transform_0, window_bounds = array<i64: 64, 32>}, {pipeline_mode = #tpu.pipeline_mode<synchronous>, transform_indices = @transform_1, window_bounds = array<i64: 32, 32>}, {pipeline_mode = #tpu.pipeline_mode<synchronous>, transform_indices = @transform_2, window_bounds = array<i64: 1, 32>}, {transform_indices = @transform_3, window_bounds = array<i64: 64, 32>}]} {
    %c0 = arith.constant 0 : index
    %c0_0 = arith.constant 0 : index
    %0 = vector.load %arg1[%c0, %c0_0] : memref<64x32xbf16, #tpu.memory_space<vmem>>, vector<64x32xbf16>
    %c0_1 = arith.constant 0 : index
    %c0_2 = arith.constant 0 : index
    %1 = vector.load %arg2[%c0_1, %c0_2] : memref<32x32xbf16, #tpu.memory_space<vmem>>, vector<32x32xbf16>
    %cst = arith.constant dense<0.000000e+00> : vector<64x32xf32>
    %2 = tpu.matmul %0, %1, %cst {dimension_numbers = #tpu.dot_dimension_numbers<[1], [0], [0], [1], [0, 0, 1, 1], [], []>} : vector<64x32xbf16>, vector<32x32xbf16>, vector<64x32xf32> -> vector<64x32xf32>
    %c0_3 = arith.constant 0 : index
    %c0_4 = arith.constant 0 : index
    %3 = vector.load %arg3[%c0_3, %c0_4] : memref<1x32xf32, #tpu.memory_space<vmem>>, vector<1x32xf32>
    %4 = vector.broadcast %3 : vector<1x32xf32> to vector<64x32xf32>
    %5 = arith.addf %2, %4 : vector<64x32xf32>
    %6 = arith.truncf %5 : vector<64x32xf32> to vector<64x32xbf16>
    %c0_5 = arith.constant 0 : index
    %c0_6 = arith.constant 0 : index
    %7 = vector.load %arg4[%c0_5, %c0_6] : memref<64x32xbf16, #tpu.memory_space<vmem>>, vector<64x32xbf16>
    tpu.vector_store %arg4[%c0_5, %c0_6], %6 {strides = array<i32>} : memref<64x32xbf16, #tpu.memory_space<vmem>>, vector<64x32xbf16>,
    return
  }
  func.func @transform_0(%arg0: i32) -> (i32, i32) {
    %c0_i32 = arith.constant 0 : i32
    %c0_i32_0 = arith.constant 0 : i32
    return %arg0, %c0_i32 : i32, i32
  }
  func.func @transform_1(%arg0: i32) -> (i32, i32) {
    %c0_i32 = arith.constant 0 : i32
    %c0_i32_0 = arith.constant 0 : i32
    %c0_i32_1 = arith.constant 0 : i32
    return %c0_i32, %c0_i32_0 : i32, i32
  }
  func.func @transform_2(%arg0: i32) -> (i32, i32) {
    %c0_i32 = arith.constant 0 : i32
    %c0_i32_0 = arith.constant 0 : i32
    %c0_i32_1 = arith.constant 0 : i32
    return %c0_i32, %c0_i32_0 : i32, i32
  }
  func.func @transform_3(%arg0: i32) -> (i32, i32) {
    %c0_i32 = arith.constant 0 : i32
    %c0_i32_0 = arith.constant 0 : i32
    return %arg0, %c0_i32 : i32, i32
  }
}

</mosaic_0001>

<bundles_post_ra>
// kernel: tpu_custom_call.1
= control target key start
LH: loop header
LB: loop body
LE: loop exit
PB: predicated region body
PF: predicated region fallthrough
CT: control target
= control target key end

     0   :  { %s503_s12 = smov 0   ;;  %s537_s0 = inlined_call_operand.vmem [shape: bf16[704,32], index: 0, kind: input, shape index: {}]   ;;  %s538_s1 = inlined_call_operand.vmem [shape: bf16[32,32], index: 1, kind: input, shape index: {}]   ;;  %s539_s2 = inlined_call_operand.vmem [shape: f32[1,32], index: 2, kind: input, shape index: {}]   ;;  %s540_s3 = inlined_call_operand.vmem [shape: bf16[704,32], index: 3, kind: output, shape index: {}]  }
   0x1 LB: > { %s401_s13 = sadd.s32 4294967295, %s481_s12   ;;  %p405_p0 = scmp.ge.s32.totalorder %s481_s12, 1  ;;  %s481_s12 = sphi %s503_s12, %s13_s12  }
   0x2   : > { %p138_p1 = scmp.lt.s32.totalorder %s481_s12, 12 }
   0x4   : > { %p139_p2 = pnand %p405_p0, %p138_p1 }
   0x5   : > { %s406_s16 = sshll.u32 (!%p139_p2), %s401_s13, 3 }
   0x6   : > { %142 = sbr.rel (%p139_p2) target bundleno = 224 (0xe0), region = 32  ;;  %p163_p3 = scmp.lt.s32.totalorder (!%p139_p2), %s406_s16, 87 }
   0xb   : > { %v469_v0 = vld [vmem:[%s538_s1 + $0x8] sm:$0xff]   ;;  %v470_v1 = vld [vmem:[%s538_s1] sm:$0xff]   ;;  %s542_s16 = smov (!%p163_p3, %s406_s16), 87  ;;  %vm226_vm0 = vcmask 261120   ;;  %vm336_vm1 = vcmask 257024  }
   0xc   : > { %445 = vmatprep.subr.bf16.mxu0 %v469_v0  ;;  %457 = vmatprep.subr.bf16.mxu1 %v469_v0  ;;  %s407_s19 = sshll.u32 %s542_s16, 2  ;;  %v410_v6 = vld [vmem:[%s539_s2] ss:$0 sm:$0xff] }
   0xd   : > { %446 = vmatpush3.bf16.msra.mxu0 %v469_v0  ;;  %459 = vmatpush3.bf16.msra.mxu1 %v469_v0  ;;  %s166_s22 = scalar_lea.vmem %s537_s0, %s407_s19  ;;  %s172_s27 = scalar_lea.vmem %s540_s3, %s407_s19 }
   0xe   : > { %447 = vmatprep.subr.bf16.mxu0 %v470_v1  ;;  %458 = vmatprep.subr.bf16.mxu1 %v470_v1  ;;  %v471_v2 = vld [vmem:[%s166_s22] sm:$0xff]   ;;  %v472_v3 = vld [vmem:[%s166_s22 + $0x10] sm:$0xff]   ;;  %v473_v4 = vld [vmem:[%s166_s22 + $0x8] sm:$0xff]  }
   0xf   : > { %449 = vmatprep.mubr.msk.bf16.mxu0 %vm226_vm0, %v471_v2  ;;  %453 = vmatprep.mubr.msk.bf16.mxu1 %vm226_vm0, %v472_v3  ;;  %v474_v5 = vld [vmem:[%s166_s22 + $0x18] sm:$0xff]  }
  0x11   : > { %448 = vmatpush3.bf16.msra.mxu0 %v470_v1  ;;  %460 = vmatpush3.bf16.msra.mxu1 %v470_v1 }
  0x14   : > { %450 = vmatmul.mubr.msk.bf16.vlgmr.msra.gmra.mxu0 %vm226_vm0, %v473_v4  ;;  %454 = vmatmul.mubr.msk.bf16.vlgmr.msra.gmra.mxu1 %vm226_vm0, %v474_v5 }
  0xd4   : > { %v451_v7 = vpop.f32.mrf.mxu0  ;;  %v455_v9 = vpop.f32.mrf.mxu1 }
  0xd5   : > { %v282_v8 = vadd.f32 %v451_v7, %v410_v6  ;;  %v298_v10 = vadd.f32 %v455_v9, %v410_v6 }
  0xd6   : > { %v273_v11 = vpop.f32.mrf.mxu0  ;;  %v289_v14 = vpop.f32.mrf.mxu1 }
  0xd7   : > { %v433_v12 = vpack.c.bf16 %v282_v8, %v282_v8  ;;  %v274_v13 = vadd.f32 %v410_v6, %v273_v11  ;;  %v437_v15 = vpack.c.bf16 %v298_v10, %v298_v10  ;;  %v290_v16 = vadd.f32 %v410_v6, %v289_v14 }
  0xd8   : > { %v452_v17 = vpop.f32.mrf.mxu0  ;;  %v456_v20 = vpop.f32.mrf.mxu1 }
  0xd9   : > { %339 = vst.msk [vmem:[%s172_s27 + $0x8] sm:$0xf] %vm336_vm1, %v433_v12  ;;  %v431_v18 = vpack.c.bf16 %v274_v13, %v274_v13  ;;  %v285_v19 = vadd.f32 %v452_v17, %v410_v6  ;;  %343 = vst.msk [vmem:[%s172_s27 + $0x18] sm:$0xf] %vm336_vm1, %v437_v15  ;;  %v435_v21 = vpack.c.bf16 %v290_v16, %v290_v16 }
  0xda   : > { %v301_v22 = vadd.f32 %v456_v20, %v410_v6  ;;  %v276_v23 = vpop.f32.mrf.mxu0  ;;  %v292_v26 = vpop.f32.mrf.mxu1 }
  0xdb   : > { %337 = vst.msk [vmem:[%s172_s27] sm:$0xf] %vm336_vm1, %v431_v18  ;;  %v434_v24 = vpack.c.bf16 %v285_v19, %v285_v19  ;;  %v277_v25 = vadd.f32 %v410_v6, %v276_v23  ;;  %341 = vst.msk [vmem:[%s172_s27 + $0x10] sm:$0xf] %vm336_vm1, %v435_v21  ;;  %v293_v28 = vadd.f32 %v410_v6, %v292_v26 }
  0xdc   : > { %v438_v27 = vpack.c.bf16 %v301_v22, %v301_v22 }
  0xdd   : > { %340 = vst.msk [vmem:[%s172_s27 + $0xc] sm:$0xf] %vm336_vm1, %v434_v24  ;;  %v432_v29 = vpack.c.bf16 %v277_v25, %v277_v25  ;;  %v436_v30 = vpack.c.bf16 %v293_v28, %v293_v28 }
  0xde   : > { %344 = vst.msk [vmem:[%s172_s27 + $0x1c] sm:$0xf] %vm336_vm1, %v438_v27 }
  0xdf   : > { %338 = vst.msk [vmem:[%s172_s27 + $0x4] sm:$0xf] %vm336_vm1, %v432_v29  ;;  %342 = vst.msk [vmem:[%s172_s27 + $0x14] sm:$0xf] %vm336_vm1, %v436_v30 }
  0xe0 PF: > { %s13_s12 = sadd.s32 1, %s481_s12  }
  0xe1   : > { %p10_p4 = scmp.ge.s32.totalorder %s13_s12, 13  }
  0xe3   :  { %12 = sbr.rel (!%p10_p4) target bundleno = 1 (0x1), region = 62 }

</bundles_post_ra>
